<compile_context>
chip_gen: v5e
topology: v5e:2x2
jax: 0.10.0
libtpu: 0.0.40
codegen_flags: <defaults>
</compile_context>

<pallas_src>
import functools

import jax
import jax.numpy as jnp
from jax.experimental import pallas as pl
from jax.experimental.pallas import tpu as pltpu


def _sublayer_connection_kernel(seed_ref, x_ref, y_ref, g_ref, b_ref, o_ref,
                                *, dropout_p, eps, hidden, row_tile):
    """z = x + dropout(y); out = gamma * (z - mean) / (std + eps) + beta."""
    z = y_ref[...].astype(jnp.float32)

    if dropout_p > 0.0:
        # Counter-based PRNG: hash(global element index, seed) -> uniform 31-bit int.
        # Tiling-independent and lowers on both Mosaic and interpret mode.
        row0 = pl.program_id(0) * row_tile
        rows_i = jax.lax.broadcasted_iota(jnp.int32, z.shape, 0) + row0
        cols_i = jax.lax.broadcasted_iota(jnp.int32, z.shape, 1)
        h = (rows_i * hidden + cols_i).astype(jnp.uint32)
        h = h ^ (seed_ref[0].astype(jnp.uint32) * jnp.uint32(0x9E3779B1))
        # murmur3 fmix32
        h = h ^ (h >> 16)
        h = h * jnp.uint32(0x85EBCA6B)
        h = h ^ (h >> 13)
        h = h * jnp.uint32(0xC2B2AE35)
        h = h ^ (h >> 16)
        r = (h >> 1).astype(jnp.int32)                       # uniform in [0, 2^31)
        thresh = min(int(round(dropout_p * 2147483648.0)), 2147483647)
        keep = r >= jnp.int32(thresh)                        # P(keep) = 1 - p
        inv_keep = jnp.float32(1.0 / (1.0 - dropout_p))
        z = jnp.where(keep, z * inv_keep, jnp.float32(0.0))  # inverted dropout

    # Residual connection.
    z = x_ref[...].astype(jnp.float32) + z

    # LayerNorm, Annotated-Transformer style:
    #   mean over last dim, std with Bessel correction (torch.std default),
    #   eps added to std (not to variance).
    mean = jnp.mean(z, axis=-1, keepdims=True)
    diff = z - mean
    var = jnp.sum(diff * diff, axis=-1, keepdims=True) * (1.0 / (hidden - 1))
    std = jnp.sqrt(var)
    inv = 1.0 / (std + eps)            # per-row scalar column; broadcast multiply below
    normed = diff * inv

    o_ref[...] = (g_ref[...].astype(jnp.float32) * normed
                  + b_ref[...].astype(jnp.float32)).astype(o_ref.dtype)


def sublayer_connection(x, y, gamma, beta, *, dropout_p=0.1, eps=1e-6, seed=0,
                        row_tile=None, vmem_limit_bytes=48 << 20):
    """x: residual input, y: sublayer(x) output (same shape). Returns norm(x + dropout(y))."""
    orig_shape = x.shape
    hidden = orig_shape[-1]
    xr = x.reshape(-1, hidden)
    yr = y.reshape(-1, hidden)
    rows = xr.shape[0]

    # Pick a large row tile: this kernel is purely HBM-bandwidth bound, so per-step
    # pipeline overhead (~0.35us) must be amortized.  Target ~2 MiB f32 blocks,
    # clamped to the row count, rounded to a multiple of 8 sublanes.
    if row_tile is None:
        target_bytes = 2 << 20
        rt = max(8, min(rows, target_bytes // (hidden * 4)))
        row_tile = max(8, (rt // 8) * 8)

    # Pad rows to a multiple of row_tile; padded rows compute harmlessly
    # (0/(0+eps) = 0) and are sliced off afterwards.
    rows_p = ((rows + row_tile - 1) // row_tile) * row_tile
    if rows_p != rows:
        pad = rows_p - rows
        xr = jnp.pad(xr, ((0, pad), (0, 0)))
        yr = jnp.pad(yr, ((0, pad), (0, 0)))

    g2 = gamma.reshape(1, hidden)
    b2 = beta.reshape(1, hidden)
    seed_arr = jnp.array([seed], dtype=jnp.int32)

    kernel = functools.partial(_sublayer_connection_kernel,
                               dropout_p=float(dropout_p), eps=float(eps),
                               hidden=hidden, row_tile=row_tile)

    out = pl.pallas_call(
        kernel,
        out_shape=jax.ShapeDtypeStruct((rows_p, hidden), x.dtype),
        grid_spec=pltpu.PrefetchScalarGridSpec(
            num_scalar_prefetch=1,            # dropout seed lands in SMEM
            grid=(rows_p // row_tile,),
            in_specs=[
                pl.BlockSpec((row_tile, hidden), lambda i, s: (i, 0)),   # x
                pl.BlockSpec((row_tile, hidden), lambda i, s: (i, 0)),   # sublayer(x)
                pl.BlockSpec(memory_space=pltpu.MemorySpace.VMEM),       # gamma (resident)
                pl.BlockSpec(memory_space=pltpu.MemorySpace.VMEM),       # beta  (resident)
            ],
            out_specs=pl.BlockSpec((row_tile, hidden), lambda i, s: (i, 0)),
        ),
        compiler_params=pltpu.CompilerParams(
            dimension_semantics=("parallel",),      # rows are independent -> megacore
            vmem_limit_bytes=vmem_limit_bytes),
    )(seed_arr, xr, yr, g2, b2)

    if rows_p != rows:
        out = out[:rows]
    return out.reshape(orig_shape)


def _reference_no_dropout(x, y, gamma, beta, eps=1e-6):
    z = x + y
    mean = jnp.mean(z, axis=-1, keepdims=True)
    var = jnp.sum((z - mean) ** 2, axis=-1, keepdims=True) / (z.shape[-1] - 1)
    std = jnp.sqrt(var)
    return gamma * (z - mean) / (std + eps) + beta


if __name__ == "__main__":
    # Small shapes: batch=2, seq=8, hidden=128 (LayerNorm "size" = 128).
    batch, seq, hidden = 2, 8, 128
    dropout_p = 0.1

    key = jax.random.PRNGKey(0)
    kx, kw, kb = jax.random.split(key, 3)

    x = jax.random.normal(kx, (batch, seq, hidden), dtype=jnp.float32)

    # Deterministic "sublayer": a simple linear projection (plain-JAX glue).
    w = jax.random.normal(kw, (hidden, hidden), dtype=jnp.float32) * 0.02
    b = jax.random.normal(kb, (hidden,), dtype=jnp.float32) * 0.02
    sublayer = lambda t: jnp.einsum("bsh,hk->bsk", t, w) + b
    y = sublayer(x)

    # LayerNorm parameters (default init: ones / zeros).
    gamma = jnp.ones((hidden,), dtype=jnp.float32)
    beta = jnp.zeros((hidden,), dtype=jnp.float32)

    # Correctness sanity check with dropout disabled (deterministic path).
    out_nodrop = sublayer_connection(x, y, gamma, beta, dropout_p=0.0, seed=0)
    ref_nodrop = _reference_no_dropout(x, y, gamma, beta)
    assert jnp.allclose(out_nodrop, ref_nodrop, atol=1e-5, rtol=1e-5), \
        "mismatch vs reference (dropout disabled)"

    # Full forward matching the module (training-mode dropout, deterministic seed).
    out = sublayer_connection(x, y, gamma, beta, dropout_p=dropout_p, seed=0)
    out = jax.block_until_ready(out)
    assert out.shape == (batch, seq, hidden)
    assert bool(jnp.all(jnp.isfinite(out)))

    print("KERNEL_OK")
</pallas_src>

<mosaic_0001>
module attributes {stable_mosaic.version = 11 : i64} {
  func.func @_sublayer_connection_kernel(%arg0: i32, %arg1: memref<1xi32, #tpu.memory_space<smem>>, %arg2: memref<16x128xf32, #tpu.memory_space<vmem>>, %arg3: memref<16x128xf32, #tpu.memory_space<vmem>>, %arg4: memref<1x128xf32, #tpu.memory_space<vmem>>, %arg5: memref<1x128xf32, #tpu.memory_space<vmem>>, %arg6: memref<16x128xf32, #tpu.memory_space<vmem>>) attributes {dimension_semantics = [#tpu.dimension_semantics<parallel>], iteration_bounds = array<i64: 1>, scalar_prefetch = 1 : i64, scratch_operands = 0 : i64, tpu.core_type = #tpu.core_type<tc>, window_params = [{transform_indices = @transform_0, window_bounds = array<i64: 16, 128>}, {transform_indices = @transform_1, window_bounds = array<i64: 16, 128>}, {pipeline_mode = #tpu.pipeline_mode<synchronous>, transform_indices = @transform_2, window_bounds = array<i64: 1, 128>}, {pipeline_mode = #tpu.pipeline_mode<synchronous>, transform_indices = @transform_3, window_bounds = array<i64: 1, 128>}, {transform_indices = @transform_4, window_bounds = array<i64: 16, 128>}]} {
    %c0 = arith.constant 0 : index
    %c0_0 = arith.constant 0 : index
    %0 = vector.load %arg3[%c0, %c0_0] : memref<16x128xf32, #tpu.memory_space<vmem>>, vector<16x128xf32>
    %c0_1 = arith.constant 0 : index
    %c0_2 = arith.constant 0 : index
    %1 = vector.load %arg2[%c0_1, %c0_2] : memref<16x128xf32, #tpu.memory_space<vmem>>, vector<16x128xf32>
    %2 = arith.addf %1, %0 : vector<16x128xf32>
    %cst = arith.constant dense<0.000000e+00> : vector<16xf32>
    %3 = vector.multi_reduction <add>, %2, %cst [1] : vector<16x128xf32> to vector<16xf32>
    %4 = vector.shape_cast %3 : vector<16xf32> to vector<16x1xf32>
    %cst_3 = arith.constant 1.280000e+02 : f32
    %5 = vector.broadcast %cst_3 : f32 to vector<16x1xf32>
    %6 = arith.divf %4, %5 : vector<16x1xf32>
    %7 = vector.broadcast %6 : vector<16x1xf32> to vector<16x128xf32>
    %8 = arith.subf %2, %7 : vector<16x128xf32>
    %9 = arith.mulf %8, %8 : vector<16x128xf32>
    %cst_4 = arith.constant dense<0.000000e+00> : vector<16xf32>
    %10 = vector.multi_reduction <add>, %9, %cst_4 [1] : vector<16x128xf32> to vector<16xf32>
    %11 = vector.shape_cast %10 : vector<16xf32> to vector<16x1xf32>
    %cst_5 = arith.constant 0.00787401571 : f32
    %12 = vector.broadcast %cst_5 : f32 to vector<16x1xf32>
    %13 = arith.mulf %11, %12 : vector<16x1xf32>
    %14 = math.sqrt %13 : vector<16x1xf32>
    %cst_6 = arith.constant 9.99999997E-7 : f32
    %15 = vector.broadcast %cst_6 : f32 to vector<16x1xf32>
    %16 = arith.addf %14, %15 : vector<16x1xf32>
    %cst_7 = arith.constant 1.000000e+00 : f32
    %17 = vector.broadcast %cst_7 : f32 to vector<16x1xf32>
    %18 = arith.divf %17, %16 : vector<16x1xf32>
    %19 = vector.broadcast %18 : vector<16x1xf32> to vector<16x128xf32>
    %20 = arith.mulf %8, %19 : vector<16x128xf32>
    %c0_8 = arith.constant 0 : index
    %c0_9 = arith.constant 0 : index
    %21 = vector.load %arg4[%c0_8, %c0_9] : memref<1x128xf32, #tpu.memory_space<vmem>>, vector<1x128xf32>
    %22 = vector.broadcast %21 : vector<1x128xf32> to vector<16x128xf32>
    %23 = arith.mulf %22, %20 : vector<16x128xf32>
    %c0_10 = arith.constant 0 : index
    %c0_11 = arith.constant 0 : index
    %24 = vector.load %arg5[%c0_10, %c0_11] : memref<1x128xf32, #tpu.memory_space<vmem>>, vector<1x128xf32>
    %25 = vector.broadcast %24 : vector<1x128xf32> to vector<16x128xf32>
    %26 = arith.addf %23, %25 : vector<16x128xf32>
    %c0_12 = arith.constant 0 : index
    %c0_13 = arith.constant 0 : index
    %27 = vector.load %arg6[%c0_12, %c0_13] : memref<16x128xf32, #tpu.memory_space<vmem>>, vector<16x128xf32>
    tpu.vector_store %arg6[%c0_12, %c0_13], %26 {strides = array<i32>} : memref<16x128xf32, #tpu.memory_space<vmem>>, vector<16x128xf32>,
    return
  }
  func.func @transform_0(%arg0: i32, %arg1: memref<1xi32, #tpu.memory_space<smem>>) -> (i32, i32) {
    %c0_i32 = arith.constant 0 : i32
    %c0_i32_0 = arith.constant 0 : i32
    return %arg0, %c0_i32 : i32, i32
  }
  func.func @transform_1(%arg0: i32, %arg1: memref<1xi32, #tpu.memory_space<smem>>) -> (i32, i32) {
    %c0_i32 = arith.constant 0 : i32
    %c0_i32_0 = arith.constant 0 : i32
    return %arg0, %c0_i32 : i32, i32
  }
  func.func @transform_2(%arg0: i32, %arg1: memref<1xi32, #tpu.memory_space<smem>>) -> (i32, i32) {
    %c0_i32 = arith.constant 0 : i32
    %c0_i32_0 = arith.constant 0 : i32
    %c0_i32_1 = arith.constant 0 : i32
    return %c0_i32, %c0_i32_0 : i32, i32
  }
  func.func @transform_3(%arg0: i32, %arg1: memref<1xi32, #tpu.memory_space<smem>>) -> (i32, i32) {
    %c0_i32 = arith.constant 0 : i32
    %c0_i32_0 = arith.constant 0 : i32
    %c0_i32_1 = arith.constant 0 : i32
    return %c0_i32, %c0_i32_0 : i32, i32
  }
  func.func @transform_4(%arg0: i32, %arg1: memref<1xi32, #tpu.memory_space<smem>>) -> (i32, i32) {
    %c0_i32 = arith.constant 0 : i32
    %c0_i32_0 = arith.constant 0 : i32
    return %arg0, %c0_i32 : i32, i32
  }
}

</mosaic_0001>

<bundles_post_ra>
// kernel: tpu_custom_call.1
= control target key start
LH: loop header
LB: loop body
LE: loop exit
PB: predicated region body
PF: predicated region fallthrough
CT: control target
= control target key end

     0   :  { %11 = vsyncpa [#allocation5], 0  ;;  %s334_s0 = inlined_call_operand.<no memory space> [shape: s32[1], index: 0, kind: input, shape index: {}]   ;;  %s335_s1 = inlined_call_operand.hbm [shape: f32[16,128], index: 1, kind: input, shape index: {}]   ;;  %s336_s2 = inlined_call_operand.hbm [shape: f32[16,128], index: 2, kind: input, shape index: {}]   ;;  %s337_s3 = inlined_call_operand.vmem [shape: f32[1,128], index: 3, kind: input, shape index: {}]   ;;  %s338_s4 = inlined_call_operand.vmem [shape: f32[1,128], index: 4, kind: input, shape index: {}]   ;;  %s339_s5 = inlined_call_operand.hbm [shape: f32[16,128], index: 5, kind: output, shape index: {}]  }
   0x1   :  { %12 = vsyncpa [#allocation8], 0 }
   0x2   :  { %13 = vsyncpa [#allocation6], 0  ;;  %s18_s19 = sshll.u32 %s335_s1, 4  ;;  %s269_s20 = smov [#allocation4]   ;;  %s19_s19 = int_to_ptr.hbm [resolvable:$true] %s18_s19 }
   0x3   :  { %s20_s21 = sshll.u32 %s269_s20, 4  ;;  %s31_s24 = sshll.u32 %s336_s2, 4  ;;  %s21_s21 = int_to_ptr.vmem [resolvable:$true] %s20_s21  ;;  %s32_s24 = int_to_ptr.hbm [resolvable:$true] %s31_s24 }
   0x4   :  { %s270_s25 = smov 128   ;;  %s271_s26 = smov 8  }
   0x5   :  { %26 = dma.hbm_to_vmem [thread:$0]  %s19_s19, 256, %s21_s21, [#allocation5], %s270_s25, %s270_s25, %s271_s26  }
   0x6   :  { %s272_s27 = smov [#allocation7]  }
   0x7   :  { %s33_s28 = sshll.u32 %s272_s27, 4  ;;  %s34_s28 = int_to_ptr.vmem [resolvable:$true] %s33_s28 }
   0x8   :  { %39 = dma.hbm_to_vmem [thread:$0]  %s32_s24, 256, %s34_s28, [#allocation8], %s270_s25, %s270_s25, %s271_s26  }
   0x9   :  { %263 = dma.done.wait [#allocation5], 256  }
   0xa   :  { %264 = vsyncadd [#allocation5], 4294967040 }
   0xb   :  { %265 = dma.done.wait [#allocation8], 256  }
   0xc   :  { %266 = vsyncadd [#allocation8], 4294967040  ;;  %v52_v0 = vld [vmem:[#allocation7] sm:$0xff]  ;;  %v54_v1 = vld [vmem:[#allocation4] sm:$0xff]  ;;  %v273_v6 = vmov 128.0   ;;  %s159_s8 = sshll.u32 %s339_s5, 4  ;;  %s160_s8 = int_to_ptr.hbm [resolvable:$true] %s159_s8 }
   0xd   :  { %v56_v2 = vadd.f32 %v54_v1, %v52_v0  ;;  %v53_v3 = vld [vmem:[#allocation7 + $0x8] sm:$0xff]  ;;  %v55_v4 = vld [vmem:[#allocation4 + $0x8] sm:$0xff]  ;;  %181 = vrcp.f32 %v273_v6  ;;  %v179_v58 = vld [vmem:[%s337_s3] ss:$0 sm:$0xff]  ;;  %s274_s3 = smov [#allocation9]  }
   0xe   :  { %v57_v5 = vadd.f32 %v55_v4, %v53_v3  ;;  %v180_v62 = vld [vmem:[%s338_s4] ss:$0 sm:$0xff]  ;;  %s157_s6 = sshll.u32 %s274_s3, 4  ;;  %s158_s6 = int_to_ptr.vmem [resolvable:$true] %s157_s6 }
   0xf   :  { %58 = vadd.xlane.f32.xlu0 %v56_v2 }
  0x13   :  { %v182_v7 = vpop.eup %181 }
  0x14   :  { %v63_v8 = vmul.f32 128.0, %v182_v7  ;;  %vm67_vm0 = vweird.f32 %v182_v7 }
  0x16   :  { %v64_v9 = vsub.f32 1.0, %v63_v8 }
  0x17   :  { %60 = vadd.xlane.f32.xlu0 %v57_v5 }
  0x18   :  { %v65_v10 = vmul.f32 %v182_v7, %v64_v9 }
  0x1a   :  { %v66_v11 = vadd.f32 %v182_v7, %v65_v10 }
  0x1c   :  { %v68_v12 = vsel %vm67_vm0, %v182_v7, %v66_v11 }
  0x82   :  { %v59_v13 = vpop.xlane.xlu0 %58 }
  0x83   :  { %v69_v14 = vmul.f32 %v68_v12, %v59_v13 }
  0x85   :  { %v71_v15 = vsub.f32 %v56_v2, %v69_v14 }
  0x87   :  { %v73_v16 = vmul.f32 %v71_v15, %v71_v15 }
  0x89   :  { %75 = vadd.xlane.f32.xlu1 %v73_v16 }
  0x8a   :  { %v61_v17 = vpop.xlane.xlu0 %60 }
  0x8b   :  { %v70_v18 = vmul.f32 %v68_v12, %v61_v17 }
  0x8d   :  { %v317_v19 = vsub.f32 %v57_v5, %v70_v18 }
  0x8f   :  { %v74_v20 = vmul.f32 %v317_v19, %v317_v19 }
  0x91   :  { %77 = vadd.xlane.f32.xlu1 %v74_v20 }
  0xfc   :  { %v76_v21 = vpop.xlane.xlu1 %75 }
  0xfd   :  { %v79_v22 = vmul.f32 0.007874016, %v76_v21 }
  0xff   :  { %183 = vrsqrt.f32 %v79_v22  ;;  %vm88_vm1 = vcmp.eq.f32.partialorder %v79_v22, inf  ;;  %v91_v35 = vand.u32 2147483648, %v79_v22  ;;  %vm90_vm2 = vcmp.eq.f32.partialorder %v79_v22, 0.0 }
 0x104   :  { %v78_v23 = vpop.xlane.xlu1 %77 }
 0x105   :  { %v184_v24 = vpop.eup %183  ;;  %v80_v25 = vmul.f32 0.007874016, %v78_v23 }
 0x106   :  { %v82_v26 = vmul.f32 %v184_v24, %v79_v22 }
 0x107   :  { %185 = vrsqrt.f32 %v80_v25  ;;  %vm100_vm3 = vcmp.eq.f32.partialorder %v80_v25, inf  ;;  %v103_v43 = vand.u32 2147483648, %v80_v25  ;;  %vm102_vm4 = vcmp.eq.f32.partialorder %v80_v25, 0.0 }
 0x108   :  { %v83_v27 = vmul.f32 %v184_v24, %v82_v26 }
 0x10a   :  { %v84_v28 = vmul.f32 0.5, %v83_v27 }
 0x10c   :  { %v85_v29 = vsub.f32 1.5, %v84_v28 }
 0x10d   :  { %v186_v30 = vpop.eup %185 }
 0x10e   :  { %v86_v31 = vmul.f32 %v184_v24, %v85_v29  ;;  %v94_v32 = vmul.f32 %v186_v30, %v80_v25 }
 0x110   :  { %v87_v33 = vmul.f32 %v86_v31, %v79_v22  ;;  %v95_v34 = vmul.f32 %v186_v30, %v94_v32 }
 0x112   :  { %v89_v36 = vsel %vm88_vm1, %v79_v22, %v87_v33  ;;  %v96_v37 = vmul.f32 0.5, %v95_v34 }
 0x113   :  { %v92_v38 = vsel %vm90_vm2, %v91_v35, %v89_v36 }
 0x114   :  { %v105_v39 = vadd.f32 1e-06, %v92_v38  ;;  %v97_v40 = vsub.f32 1.5, %v96_v37 }
 0x116   :  { %187 = vrcp.f32 %v105_v39  ;;  %v98_v41 = vmul.f32 %v186_v30, %v97_v40  ;;  %v118_v50 = vand.u32 2147483648, %v105_v39  ;;  %v116_v52 = vand.u32 2147483647, %v105_v39 }
 0x117   :  { %vm112_vm6 = vweird.f32 %v105_v39 }
 0x118   :  { %v99_v42 = vmul.f32 %v98_v41, %v80_v25  ;;  %v119_v55 = vor.u32 1.1754944e-38, %v118_v50  ;;  %vm117_vm8 = vcmp.eq.f32.partialorder %v116_v52, 8.507059e+37 }
 0x11a   :  { %v101_v44 = vsel %vm100_vm3, %v80_v25, %v99_v42 }
 0x11b   :  { %v104_v45 = vsel %vm102_vm4, %v103_v43, %v101_v44 }
 0x11c   :  { %v188_v46 = vpop.eup %187  ;;  %v106_v47 = vadd.f32 1e-06, %v104_v45 }
 0x11d   :  { %v108_v48 = vmul.f32 %v188_v46, %v105_v39  ;;  %vm113_vm5 = vweird.f32 %v188_v46 }
 0x11e   :  { %189 = vrcp.f32 %v106_v47  ;;  %vm114_vm7 = vmor %vm112_vm6, %vm113_vm5  ;;  %v133_v63 = vand.u32 2147483648, %v106_v47  ;;  %v131_v1 = vand.u32 2147483647, %v106_v47  ;;  %vm127_vm10 = vweird.f32 %v106_v47 }
 0x11f   :  { %v109_v49 = vsub.f32 1.0, %v108_v48 }
 0x120   :  { %v134_v5 = vor.u32 1.1754944e-38, %v133_v63  ;;  %vm132_vm12 = vcmp.eq.f32.partialorder %v131_v1, 8.507059e+37 }
 0x121   :  { %v110_v51 = vmul.f32 %v188_v46, %v109_v49 }
 0x123   :  { %v111_v53 = vadd.f32 %v188_v46, %v110_v51 }
 0x124   :  { %v190_v54 = vpop.eup %189 }
 0x125   :  { %v115_v56 = vsel %vm114_vm7, %v188_v46, %v111_v53  ;;  %v123_v57 = vmul.f32 %v190_v54, %v106_v47  ;;  %vm128_vm9 = vweird.f32 %v190_v54 }
 0x126   :  { %v120_v59 = vsel %vm117_vm8, %v119_v55, %v115_v56  ;;  %vm129_vm11 = vmor %vm127_vm10, %vm128_vm9 }
 0x127   :  { %v124_v60 = vsub.f32 1.0, %v123_v57  ;;  %v137_v61 = vmul.f32 %v120_v59, %v71_v15 }
 0x129   :  { %v125_v0 = vmul.f32 %v190_v54, %v124_v60  ;;  %v143_v2 = vmul.f32 %v179_v58, %v137_v61 }
 0x12b   :  { %v126_v3 = vadd.f32 %v190_v54, %v125_v0  ;;  %v149_v4 = vadd.f32 %v180_v62, %v143_v2 }
 0x12d   :  { %v130_v6 = vsel %vm129_vm11, %v190_v54, %v126_v3  ;;  %151 = vst [vmem:[#allocation9] sm:$0xff] %v149_v4 }
 0x12e   :  { %v135_v7 = vsel %vm132_vm12, %v134_v5, %v130_v6 }
 0x12f   :  { %v138_v8 = vmul.f32 %v135_v7, %v317_v19 }
 0x131   :  { %v144_v9 = vmul.f32 %v179_v58, %v138_v8 }
 0x133   :  { %v150_v10 = vadd.f32 %v180_v62, %v144_v9 }
 0x135   :  { %152 = vst [vmem:[#allocation9 + $0x8] sm:$0xff] %v150_v10 }
 0x136   :  { %165 = dma.vmem_to_hbm [thread:$0]  %s158_s6, 256, %s160_s8, [#allocation6], %s270_s25, %s270_s25, %s271_s26  }
 0x137   :  { %267 = dma.done.wait [#allocation6], 256  }
 0x138   :  { %268 = vsyncadd [#allocation6], 4294967040 }
 0x139   :  { %170 = vsyncpa [#allocation5], 1 }
 0x13a   :  { %171 = vsyncpa [#allocation8], 1 }
 0x13b   :  { %172 = vsyncpa [#allocation6], 1 }

</bundles_post_ra>
